<compile_context>
chip_gen: v7x
topology: tpu7x:2x2x1
jax: 0.10.0
libtpu: 0.0.40
codegen_flags: <defaults>
</compile_context>

<pallas_src>
import functools
import math

import jax
import jax.numpy as jnp
from jax.experimental import pallas as pl
from jax.experimental.pallas import tpu as pltpu


def _leaky_relu(x, slope=0.1):
    return jnp.maximum(x, slope * x)


def _round_up(n, m):
    return ((n + m - 1) // m) * m


def _pad_channels(P, cout=3, max_pad=32):
    # Smallest cpad >= cout with P*cpad a multiple of 128 (lane-dense output
    # store), capped so pathological P cannot blow up the output slab; fall
    # back to sublane-aligned (multiple of 8) padding otherwise.
    for cpad in range(cout, max_pad + 1):
        if (P * cpad) % 128 == 0:
            return cpad
    return ((cout + 7) // 8) * 8


# --------------------------------------------------------------------------- #
# Kernel: five fused matmuls per batch chain on a (B*V, features) slab.
# All operands live fully in VMEM (no grid); B chains are unrolled so the
# scheduler interleaves them (M per chain is tiny -> latency-bound otherwise).
# --------------------------------------------------------------------------- #
def _pcm_kernel(x_ref,
                wc1_ref, bc1_ref,       # conv1 (block-diag, BN+bias folded, padded)
                wf1_ref, bf1_ref,       # fc1   (feat part; temb folded into (B, 2PE) bias)
                wc2_ref, bc2_ref,       # conv2 (block-diag, BN+bias folded)
                wf2_ref, bf2_ref,       # fc2
                wc3_ref, bc3_ref,       # conv3 (block-diag, lane-dense padded)
                out_ref, *, B, V):
    # Load shared weight / bias slabs once.
    wc1, bc1 = wc1_ref[...], bc1_ref[...]
    wf1 = wf1_ref[...]
    wc2, bc2 = wc2_ref[...], bc2_ref[...]
    wf2, bf2 = wf2_ref[...], bf2_ref[...]
    wc3, bc3 = wc3_ref[...], bc3_ref[...]

    # B independent per-batch chains, fully unrolled.
    for b in range(B):
        rows = pl.ds(b * V, V)
        h = x_ref[rows, :]
        h = _leaky_relu(jnp.dot(h, wc1, preferred_element_type=jnp.float32) + bc1)
        h = _leaky_relu(jnp.dot(h, wf1, preferred_element_type=jnp.float32)
                        + bf1_ref[pl.ds(b, 1), :])
        h = _leaky_relu(jnp.dot(h, wc2, preferred_element_type=jnp.float32) + bc2)
        h = _leaky_relu(jnp.dot(h, wf2, preferred_element_type=jnp.float32) + bf2)
        out_ref[rows, :] = (
            jnp.dot(h, wc3, preferred_element_type=jnp.float32) + bc3)


# --------------------------------------------------------------------------- #
# One-time parameter preparation: fold BN / biases, build block-diagonal conv
# weights, split fc1 into feature / time-embedding parts, pad to lane-dense
# widths.  Runs eagerly once; the forward never redoes this work.
# --------------------------------------------------------------------------- #
def prepare_params(params, eps=1e-5):
    f32 = jnp.float32
    Cin = params["conv1_w"].shape[0]
    Tdim = params["embedf_w1"].shape[0]
    E = Cin + Tdim
    PE = params["fc1_w"].shape[1]
    P = PE // E
    assert P * E == PE, (P, E, PE)
    Cout = params["conv3_w"].shape[0]
    Cpad = _pad_channels(P, Cout)
    assert Cpad <= 32, f"padded conv3 channels too large: {Cpad}"

    eye_p = jnp.eye(P, dtype=f32)
    K1 = _round_up(P * Cin, 128)        # padded width of x slab / conv1 output

    # conv1 + bn1 folded into one (in,out) weight + shift, padded to (K1, K1).
    s1 = params["bn1_gamma"] / jnp.sqrt(params["bn1_var"] + eps)
    w1_eff = params["conv1_w"].astype(f32).T * s1[None, :]          # (Cin, Cin)
    b1_eff = (params["conv1_b"] - params["bn1_mean"]) * s1 + params["bn1_beta"]
    wc1 = (jnp.zeros((K1, K1), f32)
           .at[:P * Cin, :P * Cin].set(jnp.kron(eye_p, w1_eff)))
    bc1 = jnp.zeros((1, K1), f32).at[0, :P * Cin].set(jnp.tile(b1_eff, P))

    # fc1: feature columns (padded rows to K1) vs temb columns (folded into a
    # per-batch bias at forward time).
    wf1_all = params["fc1_w"].astype(f32).reshape(2 * P * E, P, E)
    wf1_feat = wf1_all[:, :, :Cin].reshape(2 * P * E, P * Cin).T    # (P*Cin, 2PE)
    wf1 = jnp.zeros((K1, 2 * P * E), f32).at[:P * Cin, :].set(wf1_feat)
    wf1_temb_sumT = wf1_all[:, :, Cin:].sum(axis=1).T               # (Tdim, 2PE)
    fc1_b = params["fc1_b"].astype(f32).reshape(1, 2 * P * E)

    # conv2 + bn2 folded (already lane-dense: 2PE is a multiple of 128 here).
    s2 = params["bn2_gamma"] / jnp.sqrt(params["bn2_var"] + eps)
    w2_eff = params["conv2_w"].astype(f32).T * s2[None, :]          # (2E, 2E)
    b2_eff = (params["conv2_b"] - params["bn2_mean"]) * s2 + params["bn2_beta"]
    wc2 = jnp.kron(eye_p, w2_eff)                                   # (2PE, 2PE)
    bc2 = jnp.tile(b2_eff, P).reshape(1, 2 * P * E)

    # fc2
    wf2 = params["fc2_w"].astype(f32).T                             # (2PE, 4PE)
    bf2 = params["fc2_b"].astype(f32).reshape(1, 4 * P * E)

    # conv3, zero-padded to a lane-dense output width.
    w3_pad = jnp.zeros((Cpad, 4 * E), f32).at[:Cout].set(params["conv3_w"])
    b3_pad = jnp.zeros((Cpad,), f32).at[:Cout].set(params["conv3_b"])
    wc3 = jnp.kron(eye_p, w3_pad.T)                                 # (4PE, P*Cpad)
    bc3 = jnp.tile(b3_pad, P).reshape(1, P * Cpad)

    arrays = {
        "embedf_w1": params["embedf_w1"].astype(f32),
        "embedf_b1": params["embedf_b1"].astype(f32),
        "embedf_w2": params["embedf_w2"].astype(f32),
        "embedf_b2": params["embedf_b2"].astype(f32),
        "wc1": wc1, "bc1": bc1,
        "wf1": wf1, "wf1_temb_sumT": wf1_temb_sumT, "fc1_b": fc1_b,
        "wc2": wc2, "bc2": bc2,
        "wf2": wf2, "bf2": bf2,
        "wc3": wc3, "bc3": bc3,
    }
    jax.block_until_ready(arrays)
    return arrays, Cout


# --------------------------------------------------------------------------- #
# Jitted forward: only t-dependent glue + one pallas_call.
# --------------------------------------------------------------------------- #
@functools.partial(jax.jit, static_argnames=("cout",))
def _forward_impl(arrays, inputs, t, *, cout):
    f32 = jnp.float32
    B, V, P, Cin = inputs.shape
    R = B * V
    Tdim = arrays["embedf_w1"].shape[0]

    # Timestep embedding + embedf MLP (t-dependent, tiny; stays in XLA).
    half = Tdim // 2
    freqs = jnp.exp(jnp.arange(half, dtype=f32) * -(math.log(10000.0) / half))
    e = t.astype(f32)[:, None] * freqs[None, :]
    e = jnp.concatenate([jnp.sin(e), jnp.cos(e)], axis=1)
    if Tdim % 2 == 1:
        e = jnp.pad(e, ((0, 0), (0, 1)))
    h = _leaky_relu(e @ arrays["embedf_w1"].T + arrays["embedf_b1"])
    temb = h @ arrays["embedf_w2"].T + arrays["embedf_b2"]          # (B, Tdim)

    # fc1 bias with the (per-batch, point-invariant) temb contribution folded.
    bf1 = arrays["fc1_b"] + temb @ arrays["wf1_temb_sumT"]          # (B, 2PE)

    # Activation slab: rows = voxels, cols = P-major features, lane-padded.
    K1 = arrays["wc1"].shape[0]
    x2d = inputs.astype(f32).reshape(R, P * Cin)
    if K1 > P * Cin:
        x2d = jnp.pad(x2d, ((0, 0), (0, K1 - P * Cin)))

    Wout = arrays["wc3"].shape[1]                                   # P * Cpad
    Cpad = Wout // P

    kernel = functools.partial(_pcm_kernel, B=B, V=V)
    args = (x2d, arrays["wc1"], arrays["bc1"], arrays["wf1"], bf1,
            arrays["wc2"], arrays["bc2"], arrays["wf2"], arrays["bf2"],
            arrays["wc3"], arrays["bc3"])
    vmem = pl.BlockSpec(memory_space=pltpu.MemorySpace.VMEM)

    out2d = pl.pallas_call(
        kernel,
        out_shape=jax.ShapeDtypeStruct((R, Wout), jnp.float32),
        in_specs=[vmem] * len(args),
        out_specs=vmem,
    )(*args)

    return out2d.reshape(B, V, P, Cpad)[..., :cout]


def point_cloud_model_forward(prepared, inputs, t):
    arrays, cout = prepared
    return _forward_impl(arrays, inputs, t, cout=cout)


# --------------------------------------------------------------------------- #
# Pure-JAX reference mirroring the PyTorch forward (channel-last algebra).
# --------------------------------------------------------------------------- #
def _timestep_embed_and_embedf(params, t, Tdim):
    half = Tdim // 2
    freqs = jnp.exp(jnp.arange(half, dtype=jnp.float32) * -(math.log(10000.0) / half))
    e = t.astype(jnp.float32)[:, None] * freqs[None, :]
    e = jnp.concatenate([jnp.sin(e), jnp.cos(e)], axis=1)
    if Tdim % 2 == 1:
        e = jnp.pad(e, ((0, 0), (0, 1)))
    h = _leaky_relu(e @ params["embedf_w1"].T + params["embedf_b1"])
    return h @ params["embedf_w2"].T + params["embedf_b2"]          # (B, Tdim)


def reference_forward(params, inputs, t, eps=1e-5):
    B, V, P, Cin = inputs.shape
    Tdim = params["embedf_w1"].shape[0]
    E = Cin + Tdim
    temb = _timestep_embed_and_embedf(params, t, Tdim)              # (B, Tdim)

    def bn(x, g, beta, m, v):
        return (x - m) / jnp.sqrt(v + eps) * g + beta

    feat = inputs.reshape(B, V * P, Cin)
    feat = feat @ params["conv1_w"].T + params["conv1_b"]
    feat = _leaky_relu(bn(feat, params["bn1_gamma"], params["bn1_beta"],
                          params["bn1_mean"], params["bn1_var"]))
    feat = feat.reshape(B, V, P, Cin)

    temb_b = jnp.broadcast_to(temb[:, None, None, :], (B, V, P, Tdim))
    x1 = jnp.concatenate([feat, temb_b], axis=-1).reshape(B, V, P * E)
    x1 = _leaky_relu(x1 @ params["fc1_w"].T + params["fc1_b"])

    x2 = x1.reshape(B, V * P, 2 * E)
    x2 = x2 @ params["conv2_w"].T + params["conv2_b"]
    x2 = _leaky_relu(bn(x2, params["bn2_gamma"], params["bn2_beta"],
                        params["bn2_mean"], params["bn2_var"]))

    x3 = x2.reshape(B, V, P * 2 * E)
    x3 = _leaky_relu(x3 @ params["fc2_w"].T + params["fc2_b"])

    x4 = x3.reshape(B, V * P, 4 * E)
    pred = x4 @ params["conv3_w"].T + params["conv3_b"]
    return pred.reshape(B, V, P, 3)


if __name__ == "__main__":
    # Small shapes consistent with the module's forward:
    #   in_channels=6, time_embed_dim=2, embed_dim=8 (= 6+2), out_channels=3,
    #   voxel_point_max (P) = 8, voxel_num (V) = 4, batch B = 2.
    B, V, P = 2, 4, 8
    Cin, Tdim = 6, 2
    E = Cin + Tdim            # embed_dim

    key = jax.random.PRNGKey(0)
    keys = jax.random.split(key, 32)

    def nrm(k, shape, scale=0.1):
        return scale * jax.random.normal(k, shape, dtype=jnp.float32)

    params = {
        "embedf_w1": nrm(keys[0], (Tdim, Tdim)),
        "embedf_b1": nrm(keys[1], (Tdim,)),
        "embedf_w2": nrm(keys[2], (Tdim, Tdim)),
        "embedf_b2": nrm(keys[3], (Tdim,)),
        "conv1_w":   nrm(keys[4], (Cin, Cin)),
        "conv1_b":   nrm(keys[5], (Cin,)),
        "bn1_gamma": 1.0 + nrm(keys[6], (Cin,)),
        "bn1_beta":  nrm(keys[7], (Cin,)),
        "bn1_mean":  nrm(keys[8], (Cin,)),
        "bn1_var":   1.0 + 0.1 * jnp.abs(jax.random.normal(keys[9], (Cin,), dtype=jnp.float32)),
        "fc1_w":     nrm(keys[10], (2 * P * E, P * E)),
        "fc1_b":     nrm(keys[11], (2 * P * E,)),
        "conv2_w":   nrm(keys[12], (2 * E, 2 * E)),
        "conv2_b":   nrm(keys[13], (2 * E,)),
        "bn2_gamma": 1.0 + nrm(keys[14], (2 * E,)),
        "bn2_beta":  nrm(keys[15], (2 * E,)),
        "bn2_mean":  nrm(keys[16], (2 * E,)),
        "bn2_var":   1.0 + 0.1 * jnp.abs(jax.random.normal(keys[17], (2 * E,), dtype=jnp.float32)),
        "fc2_w":     nrm(keys[18], (4 * P * E, 2 * P * E)),
        "fc2_b":     nrm(keys[19], (4 * P * E,)),
        "conv3_w":   nrm(keys[20], (3, 4 * E)),
        "conv3_b":   nrm(keys[21], (3,)),
    }

    inputs = jax.random.normal(keys[22], (B, V, P, Cin), dtype=jnp.float32)
    t = jax.random.uniform(keys[23], (B,), dtype=jnp.float32, minval=0.0, maxval=100.0)

    prepared = prepare_params(params)                 # one-time folding
    out = point_cloud_model_forward(prepared, inputs, t)
    out = jax.block_until_ready(out)

    ref = reference_forward(params, inputs, t)
    assert out.shape == (B, V, P, 3), out.shape
    err = float(jnp.max(jnp.abs(out - ref)))
    assert err < 1e-3, f"max abs err {err}"
    print("KERNEL_OK")
</pallas_src>

<mosaic_0001>
module attributes {stable_mosaic.version = 11 : i64} {
  func.func @_pcm_kernel(%arg0: memref<8x128xf32, #tpu.memory_space<vmem>>, %arg1: memref<128x128xf32, #tpu.memory_space<vmem>>, %arg2: memref<1x128xf32, #tpu.memory_space<vmem>>, %arg3: memref<128x128xf32, #tpu.memory_space<vmem>>, %arg4: memref<2x128xf32, #tpu.memory_space<vmem>>, %arg5: memref<128x128xf32, #tpu.memory_space<vmem>>, %arg6: memref<1x128xf32, #tpu.memory_space<vmem>>, %arg7: memref<128x256xf32, #tpu.memory_space<vmem>>, %arg8: memref<1x256xf32, #tpu.memory_space<vmem>>, %arg9: memref<256x128xf32, #tpu.memory_space<vmem>>, %arg10: memref<1x128xf32, #tpu.memory_space<vmem>>, %arg11: memref<8x128xf32, #tpu.memory_space<vmem>>) attributes {dimension_semantics = [], scalar_prefetch = 0 : i64, scratch_operands = 0 : i64, tpu.core_type = #tpu.core_type<tc>} {
    %c0 = arith.constant 0 : index
    %c0_0 = arith.constant 0 : index
    %0 = vector.load %arg1[%c0, %c0_0] : memref<128x128xf32, #tpu.memory_space<vmem>>, vector<128x128xf32>
    %c0_1 = arith.constant 0 : index
    %c0_2 = arith.constant 0 : index
    %1 = vector.load %arg2[%c0_1, %c0_2] : memref<1x128xf32, #tpu.memory_space<vmem>>, vector<1x128xf32>
    %c0_3 = arith.constant 0 : index
    %c0_4 = arith.constant 0 : index
    %2 = vector.load %arg3[%c0_3, %c0_4] : memref<128x128xf32, #tpu.memory_space<vmem>>, vector<128x128xf32>
    %c0_5 = arith.constant 0 : index
    %c0_6 = arith.constant 0 : index
    %3 = vector.load %arg5[%c0_5, %c0_6] : memref<128x128xf32, #tpu.memory_space<vmem>>, vector<128x128xf32>
    %c0_7 = arith.constant 0 : index
    %c0_8 = arith.constant 0 : index
    %4 = vector.load %arg6[%c0_7, %c0_8] : memref<1x128xf32, #tpu.memory_space<vmem>>, vector<1x128xf32>
    %c0_9 = arith.constant 0 : index
    %c0_10 = arith.constant 0 : index
    %5 = vector.load %arg7[%c0_9, %c0_10] : memref<128x256xf32, #tpu.memory_space<vmem>>, vector<128x256xf32>
    %c0_11 = arith.constant 0 : index
    %c0_12 = arith.constant 0 : index
    %6 = vector.load %arg8[%c0_11, %c0_12] : memref<1x256xf32, #tpu.memory_space<vmem>>, vector<1x256xf32>
    %c0_13 = arith.constant 0 : index
    %c0_14 = arith.constant 0 : index
    %7 = vector.load %arg9[%c0_13, %c0_14] : memref<256x128xf32, #tpu.memory_space<vmem>>, vector<256x128xf32>
    %c0_15 = arith.constant 0 : index
    %c0_16 = arith.constant 0 : index
    %8 = vector.load %arg10[%c0_15, %c0_16] : memref<1x128xf32, #tpu.memory_space<vmem>>, vector<1x128xf32>
    %c0_17 = arith.constant 0 : index
    %c0_18 = arith.constant 0 : index
    %9 = vector.load %arg0[%c0_17, %c0_18] : memref<8x128xf32, #tpu.memory_space<vmem>>, vector<4x128xf32>
    %cst = arith.constant dense<0.000000e+00> : vector<4x128xf32>
    %10 = tpu.matmul %9, %0, %cst {dimension_numbers = #tpu.dot_dimension_numbers<[1], [0], [0], [1], [0, 0, 1, 1], [], []>} : vector<4x128xf32>, vector<128x128xf32>, vector<4x128xf32> -> vector<4x128xf32>
    %11 = vector.broadcast %1 : vector<1x128xf32> to vector<4x128xf32>
    %12 = arith.addf %10, %11 : vector<4x128xf32>
    %cst_19 = arith.constant 1.000000e-01 : f32
    %13 = vector.broadcast %cst_19 : f32 to vector<4x128xf32>
    %14 = arith.mulf %13, %12 : vector<4x128xf32>
    %15 = arith.maximumf %12, %14 : vector<4x128xf32>
    %cst_20 = arith.constant dense<0.000000e+00> : vector<4x128xf32>
    %16 = tpu.matmul %15, %2, %cst_20 {dimension_numbers = #tpu.dot_dimension_numbers<[1], [0], [0], [1], [0, 0, 1, 1], [], []>} : vector<4x128xf32>, vector<128x128xf32>, vector<4x128xf32> -> vector<4x128xf32>
    %c0_21 = arith.constant 0 : index
    %c0_22 = arith.constant 0 : index
    %17 = vector.load %arg4[%c0_21, %c0_22] : memref<2x128xf32, #tpu.memory_space<vmem>>, vector<1x128xf32>
    %18 = vector.broadcast %17 : vector<1x128xf32> to vector<4x128xf32>
    %19 = arith.addf %16, %18 : vector<4x128xf32>
    %cst_23 = arith.constant 1.000000e-01 : f32
    %20 = vector.broadcast %cst_23 : f32 to vector<4x128xf32>
    %21 = arith.mulf %20, %19 : vector<4x128xf32>
    %22 = arith.maximumf %19, %21 : vector<4x128xf32>
    %cst_24 = arith.constant dense<0.000000e+00> : vector<4x128xf32>
    %23 = tpu.matmul %22, %3, %cst_24 {dimension_numbers = #tpu.dot_dimension_numbers<[1], [0], [0], [1], [0, 0, 1, 1], [], []>} : vector<4x128xf32>, vector<128x128xf32>, vector<4x128xf32> -> vector<4x128xf32>
    %24 = vector.broadcast %4 : vector<1x128xf32> to vector<4x128xf32>
    %25 = arith.addf %23, %24 : vector<4x128xf32>
    %cst_25 = arith.constant 1.000000e-01 : f32
    %26 = vector.broadcast %cst_25 : f32 to vector<4x128xf32>
    %27 = arith.mulf %26, %25 : vector<4x128xf32>
    %28 = arith.maximumf %25, %27 : vector<4x128xf32>
    %cst_26 = arith.constant dense<0.000000e+00> : vector<4x256xf32>
    %29 = tpu.matmul %28, %5, %cst_26 {dimension_numbers = #tpu.dot_dimension_numbers<[1], [0], [0], [1], [0, 0, 1, 1], [], []>} : vector<4x128xf32>, vector<128x256xf32>, vector<4x256xf32> -> vector<4x256xf32>
    %30 = vector.broadcast %6 : vector<1x256xf32> to vector<4x256xf32>
    %31 = arith.addf %29, %30 : vector<4x256xf32>
    %cst_27 = arith.constant 1.000000e-01 : f32
    %32 = vector.broadcast %cst_27 : f32 to vector<4x256xf32>
    %33 = arith.mulf %32, %31 : vector<4x256xf32>
    %34 = arith.maximumf %31, %33 : vector<4x256xf32>
    %cst_28 = arith.constant dense<0.000000e+00> : vector<4x128xf32>
    %35 = tpu.matmul %34, %7, %cst_28 {dimension_numbers = #tpu.dot_dimension_numbers<[1], [0], [0], [1], [0, 0, 1, 1], [], []>} : vector<4x256xf32>, vector<256x128xf32>, vector<4x128xf32> -> vector<4x128xf32>
    %36 = vector.broadcast %8 : vector<1x128xf32> to vector<4x128xf32>
    %37 = arith.addf %35, %36 : vector<4x128xf32>
    %c0_29 = arith.constant 0 : index
    %c0_30 = arith.constant 0 : index
    %38 = vector.load %arg11[%c0_29, %c0_30] : memref<8x128xf32, #tpu.memory_space<vmem>>, vector<4x128xf32>
    tpu.vector_store %arg11[%c0_29, %c0_30], %37 {strides = array<i32>} : memref<8x128xf32, #tpu.memory_space<vmem>>, vector<4x128xf32>,
    %c4 = arith.constant 4 : index
    %c0_31 = arith.constant 0 : index
    %39 = vector.load %arg0[%c4, %c0_31] : memref<8x128xf32, #tpu.memory_space<vmem>>, vector<4x128xf32>
    %cst_32 = arith.constant dense<0.000000e+00> : vector<4x128xf32>
    %40 = tpu.matmul %39, %0, %cst_32 {dimension_numbers = #tpu.dot_dimension_numbers<[1], [0], [0], [1], [0, 0, 1, 1], [], []>} : vector<4x128xf32>, vector<128x128xf32>, vector<4x128xf32> -> vector<4x128xf32>
    %41 = vector.broadcast %1 : vector<1x128xf32> to vector<4x128xf32>
    %42 = arith.addf %40, %41 : vector<4x128xf32>
    %cst_33 = arith.constant 1.000000e-01 : f32
    %43 = vector.broadcast %cst_33 : f32 to vector<4x128xf32>
    %44 = arith.mulf %43, %42 : vector<4x128xf32>
    %45 = arith.maximumf %42, %44 : vector<4x128xf32>
    %cst_34 = arith.constant dense<0.000000e+00> : vector<4x128xf32>
    %46 = tpu.matmul %45, %2, %cst_34 {dimension_numbers = #tpu.dot_dimension_numbers<[1], [0], [0], [1], [0, 0, 1, 1], [], []>} : vector<4x128xf32>, vector<128x128xf32>, vector<4x128xf32> -> vector<4x128xf32>
    %c1 = arith.constant 1 : index
    %c0_35 = arith.constant 0 : index
    %47 = vector.load %arg4[%c1, %c0_35] : memref<2x128xf32, #tpu.memory_space<vmem>>, vector<1x128xf32>
    %48 = vector.broadcast %47 : vector<1x128xf32> to vector<4x128xf32>
    %49 = arith.addf %46, %48 : vector<4x128xf32>
    %cst_36 = arith.constant 1.000000e-01 : f32
    %50 = vector.broadcast %cst_36 : f32 to vector<4x128xf32>
    %51 = arith.mulf %50, %49 : vector<4x128xf32>
    %52 = arith.maximumf %49, %51 : vector<4x128xf32>
    %cst_37 = arith.constant dense<0.000000e+00> : vector<4x128xf32>
    %53 = tpu.matmul %52, %3, %cst_37 {dimension_numbers = #tpu.dot_dimension_numbers<[1], [0], [0], [1], [0, 0, 1, 1], [], []>} : vector<4x128xf32>, vector<128x128xf32>, vector<4x128xf32> -> vector<4x128xf32>
    %54 = vector.broadcast %4 : vector<1x128xf32> to vector<4x128xf32>
    %55 = arith.addf %53, %54 : vector<4x128xf32>
    %cst_38 = arith.constant 1.000000e-01 : f32
    %56 = vector.broadcast %cst_38 : f32 to vector<4x128xf32>
    %57 = arith.mulf %56, %55 : vector<4x128xf32>
    %58 = arith.maximumf %55, %57 : vector<4x128xf32>
    %cst_39 = arith.constant dense<0.000000e+00> : vector<4x256xf32>
    %59 = tpu.matmul %58, %5, %cst_39 {dimension_numbers = #tpu.dot_dimension_numbers<[1], [0], [0], [1], [0, 0, 1, 1], [], []>} : vector<4x128xf32>, vector<128x256xf32>, vector<4x256xf32> -> vector<4x256xf32>
    %60 = vector.broadcast %6 : vector<1x256xf32> to vector<4x256xf32>
    %61 = arith.addf %59, %60 : vector<4x256xf32>
    %cst_40 = arith.constant 1.000000e-01 : f32
    %62 = vector.broadcast %cst_40 : f32 to vector<4x256xf32>
    %63 = arith.mulf %62, %61 : vector<4x256xf32>
    %64 = arith.maximumf %61, %63 : vector<4x256xf32>
    %cst_41 = arith.constant dense<0.000000e+00> : vector<4x128xf32>
    %65 = tpu.matmul %64, %7, %cst_41 {dimension_numbers = #tpu.dot_dimension_numbers<[1], [0], [0], [1], [0, 0, 1, 1], [], []>} : vector<4x256xf32>, vector<256x128xf32>, vector<4x128xf32> -> vector<4x128xf32>
    %66 = vector.broadcast %8 : vector<1x128xf32> to vector<4x128xf32>
    %67 = arith.addf %65, %66 : vector<4x128xf32>
    %c4_42 = arith.constant 4 : index
    %c0_43 = arith.constant 0 : index
    %68 = vector.load %arg11[%c4_42, %c0_43] : memref<8x128xf32, #tpu.memory_space<vmem>>, vector<4x128xf32>
    tpu.vector_store %arg11[%c4_42, %c0_43], %67 {strides = array<i32>} : memref<8x128xf32, #tpu.memory_space<vmem>>, vector<4x128xf32>,
    return
  }
}

</mosaic_0001>

<bundles_post_ra>
// kernel: _forward_impl.1
= control target key start
LH: loop header
LB: loop body
LE: loop exit
PB: predicated region body
PF: predicated region fallthrough
CT: control target
= control target key end

     0   :  { %16 = vsyncpa [#allocation3], 0  ;;  %s2314_s0 = inlined_call_operand.vmem [shape: f32[8,128], index: 0, kind: input, shape index: {}]   ;;  %s2315_s1 = inlined_call_operand.hbm [shape: f32[128,128], index: 1, kind: input, shape index: {}]   ;;  %s2316_s2 = inlined_call_operand.vmem [shape: f32[1,128], index: 2, kind: input, shape index: {}]   ;;  %s2317_s3 = inlined_call_operand.hbm [shape: f32[128,128], index: 3, kind: input, shape index: {}]   ;;  %s2318_s4 = inlined_call_operand.vmem [shape: f32[2,128], index: 4, kind: input, shape index: {}]   ;;  %s2319_s5 = inlined_call_operand.hbm [shape: f32[128,128], index: 5, kind: input, shape index: {}]   ;;  %s2320_s6 = inlined_call_operand.vmem [shape: f32[1,128], index: 6, kind: input, shape index: {}]   ;;  %s2321_s7 = inlined_call_operand.vmem [shape: f32[128,256], index: 7, kind: input, shape index: {}]   ;;  %s2322_s8 = inlined_call_operand.vmem [shape: f32[1,256], index: 8, kind: input, shape index: {}]   ;;  %s2323_s9 = inlined_call_operand.hbm [shape: f32[256,128], index: 9, kind: input, shape index: {}]   ;;  %s2324_s10 = inlined_call_operand.vmem [shape: f32[1,128], index: 10, kind: input, shape index: {}]   ;;  %s2325_s11 = inlined_call_operand.vmem [shape: f32[8,128], index: 11, kind: output, shape index: {}]  }
   0x1   :  { %17 = vsyncpa [#allocation5], 0 }
   0x2   :  { %18 = vsyncpa [#allocation8], 0  ;;  %s1743_s17 = smov [#allocation4]   ;;  %s1744_s19 = smov [#allocation2]  }
   0x3   :  { %s40_s18 = sshll.u32 %s1743_s17, 4  ;;  %s26_s20 = sshll.u32 %s1744_s19, 4  ;;  %s41_s18 = int_to_ptr.vmem [resolvable:$true] %s40_s18  ;;  %s1812_s20 = int_to_ptr.vmem [resolvable:$true] %s26_s20 }
   0x4   :  { %s1649_s23 = scalar_lea.hbm %s2317_s3, 2048 }
   0x5   :  { %p1650_p0 = scmp.ne.s32.totalorder %s2317_s3, %s1649_s23  ;;  %p1653_p1 = scmp.lt.u32.totalorder %s1649_s23, %s2317_s3 }
   0x7   :  { %p1655_p2 = pnand %p1653_p1, %p1650_p0 }
   0x9   :  { %1658 = shalt.err (!%p1655_p2)
}
   0xa   :  { %s1659_s28 = scalar_lea.vmem %s41_s18, 2048  ;;  %p1664_p4 = scmp.lt.s32.totalorder %s41_s18, %s41_s18 }
   0xb   :  { %p1660_p3 = scmp.ne.s32.totalorder %s41_s18, %s1659_s28  ;;  %p1665_p5 = scmp.lt.s32.totalorder %s1659_s28, %s1659_s28 }
   0xd   :  { %p1666_p6 = por %p1665_p5, %p1664_p4 }
   0xf   :  { %p1667_p7 = pnand %p1666_p6, %p1660_p3 }
  0x11   :  { %1670 = shalt.err (!%p1667_p7)
}
  0x12   :  { %s1745_s29 = smov 128   ;;  %s1746_s30 = smov 8  }
  0x13   :  { %46 = dma.hbm_to_vmem [thread:$0]  %s2317_s3, 2048, %s41_s18, [#allocation5], %s1745_s29, %s1745_s29, %s1746_s30  }
  0x14   :  { %s1671_s16 = scalar_lea.hbm %s2315_s1, 2048 }
  0x15   :  { %p1672_p8 = scmp.ne.s32.totalorder %s2315_s1, %s1671_s16  ;;  %p1675_p9 = scmp.lt.u32.totalorder %s1671_s16, %s2315_s1 }
  0x17   :  { %p1677_p10 = pnand %p1675_p9, %p1672_p8 }
  0x19   :  { %1680 = shalt.err (!%p1677_p10)
}
  0x1a   :  { %s1681_s23 = scalar_lea.vmem %s1812_s20, 2048  ;;  %p1686_p12 = scmp.lt.s32.totalorder %s1812_s20, %s1812_s20 }
  0x1b   :  { %p1682_p11 = scmp.ne.s32.totalorder %s1812_s20, %s1681_s23  ;;  %p1687_p13 = scmp.lt.s32.totalorder %s1681_s23, %s1681_s23 }
  0x1d   :  { %p1688_p0 = por %p1687_p13, %p1686_p12 }
  0x1f   :  { %p1689_p1 = pnand %p1688_p0, %p1682_p11 }
  0x21   :  { %1692 = shalt.err (!%p1689_p1)
}
  0x22   :  { %32 = dma.hbm_to_vmem [thread:$0]  %s2315_s1, 2048, %s1812_s20, [#allocation3], %s1745_s29, %s1745_s29, %s1746_s30  }
  0x23   :  { %s1747_s24 = smov [#allocation6]   ;;  %s1748_s26 = smov [#allocation7]  }
  0x24   :  { %s54_s25 = sshll.u32 %s1747_s24, 4  ;;  %s72_s27 = sshll.u32 %s1748_s26, 4  ;;  %s55_s25 = int_to_ptr.vmem [resolvable:$true] %s54_s25  ;;  %s1849_s27 = int_to_ptr.vmem [resolvable:$true] %s72_s27 }
  0x25   :  { %s1693_s13 = scalar_lea.hbm %s2319_s5, 2048 }
  0x26   :  { %p1694_p2 = scmp.ne.s32.totalorder %s2319_s5, %s1693_s13  ;;  %p1697_p3 = scmp.lt.u32.totalorder %s1693_s13, %s2319_s5 }
  0x28   :  { %p1699_p4 = pnand %p1697_p3, %p1694_p2 }
  0x2a   :  { %1702 = shalt.err (!%p1699_p4)
}
  0x2b   :  { %s1703_s1 = scalar_lea.vmem %s55_s25, 2048  ;;  %p1708_p6 = scmp.lt.s32.totalorder %s55_s25, %s55_s25 }
  0x2c   :  { %p1704_p5 = scmp.ne.s32.totalorder %s55_s25, %s1703_s1  ;;  %p1709_p7 = scmp.lt.s32.totalorder %s1703_s1, %s1703_s1 }
  0x2e   :  { %p1710_p8 = por %p1709_p7, %p1708_p6 }
  0x30   :  { %p1711_p9 = pnand %p1710_p8, %p1704_p5 }
  0x32   :  { %1714 = shalt.err (!%p1711_p9)
}
  0x33   :  { %60 = dma.hbm_to_vmem [thread:$0]  %s2319_s5, 2048, %s55_s25, [#allocation5], %s1745_s29, %s1745_s29, %s1746_s30  }
  0x34   :  { %s1715_s23 = scalar_lea.hbm %s2323_s9, 4096 }
  0x35   :  { %p1716_p10 = scmp.ne.s32.totalorder %s2323_s9, %s1715_s23  ;;  %p1719_p11 = scmp.lt.u32.totalorder %s1715_s23, %s2323_s9 }
  0x37   :  { %p1721_p12 = pnand %p1719_p11, %p1716_p10 }
  0x39   :  { %1724 = shalt.err (!%p1721_p12)
}
  0x3a   :  { %s1725_s28 = scalar_lea.vmem %s1849_s27, 4096  ;;  %p1730_p0 = scmp.lt.s32.totalorder %s1849_s27, %s1849_s27 }
  0x3b   :  { %p1726_p13 = scmp.ne.s32.totalorder %s1849_s27, %s1725_s28  ;;  %p1731_p1 = scmp.lt.s32.totalorder %s1725_s28, %s1725_s28 }
  0x3d   :  { %p1732_p2 = por %p1731_p1, %p1730_p0 }
  0x3f   :  { %p1733_p3 = pnand %p1732_p2, %p1726_p13 }
  0x41   :  { %1736 = shalt.err (!%p1733_p3)
}
  0x42   :  { %78 = dma.hbm_to_vmem [thread:$0]  %s2323_s9, 4096, %s1849_s27, [#allocation8], %s1745_s29, %s1745_s29, %s1746_s30  }
  0x43   :  { %1737 = dma.done.wait [#allocation3], 2048  }
  0x44   :  { %1738 = vsyncadd [#allocation3], 4294965248 }
  0x45   :  { %1739 = dma.done.wait [#allocation5], 4096  }
  0x46   :  { %1740 = vsyncadd [#allocation5], 4294963200 }
  0x47   :  { %1741 = dma.done.wait [#allocation8], 4096  }
  0x48   :  { %1742 = vsyncadd [#allocation8], 4294963200  ;;  %v1749_v0 = vmov 0.0|0.0   ;;  %vm1750_vm0 = vmmov 0   ;;  %v1751_v1 = vmov 0.0   ;;  %v93_v2 = vld [vmem:[#allocation2] sm:$0xff] }
  0x49   :  { %1368 = vmatprep.subr.bf16.mxu0 %v1749_v0  ;;  %1190 = vmatprep.mubr.msk.f32.mxu0 %vm1750_vm0, %v1751_v1  ;;  %v94_v3 = vld [vmem:[#allocation2 + $0x8] sm:$0xff]  ;;  %v95_v4 = vld [vmem:[#allocation2 + $0x10] sm:$0xff]  ;;  %v96_v6 = vld [vmem:[#allocation2 + $0x18] sm:$0xff] }
  0x4a   :  { %1392 = vmatprep.subr.bf16.mxu1 %v1749_v0  ;;  %1225 = vmatprep.mubr.msk.f32.mxu1 %vm1750_vm0, %v1751_v1  ;;  %v1892_v5 = vpack.c.bf16 %v94_v3, %v93_v2  ;;  %v1895_v7 = vpack.c.bf16 %v96_v6, %v95_v4  ;;  %v97_v8 = vld [vmem:[#allocation2 + $0x20] sm:$0xff]  ;;  %v98_v9 = vld [vmem:[#allocation2 + $0x28] sm:$0xff]  ;;  %v112_v12 = vld [vmem:[#allocation4 + $0x10] sm:$0xff] }
  0x4b   :  { %v110_v10 = vld [vmem:[#allocation4] sm:$0xff]  ;;  %v111_v11 = vld [vmem:[#allocation4 + $0x8] sm:$0xff]  ;;  %v113_v13 = vld [vmem:[#allocation4 + $0x18] sm:$0xff]  ;;  %v1899_v14 = vpack.c.bf16 %v98_v9, %v97_v8 }
  0x4c   :  { %1370 = vmatpush3.bf16.msra.mxu0 %v1892_v5  ;;  %v1901_v15 = vpack.c.bf16 %v111_v11, %v110_v10  ;;  %v99_v16 = vld [vmem:[#allocation2 + $0x30] sm:$0xff]  ;;  %v100_v17 = vld [vmem:[#allocation2 + $0x38] sm:$0xff]  ;;  %v1905_v18 = vpack.c.bf16 %v113_v13, %v112_v12  ;;  %v114_v19 = vld [vmem:[#allocation4 + $0x20] sm:$0xff] }
  0x4d   :  { %1371 = vmatprep.subr.bf16.mxu0 %v1749_v0  ;;  %v115_v20 = vld [vmem:[#allocation4 + $0x28] sm:$0xff]  ;;  %v1909_v21 = vpack.c.bf16 %v100_v17, %v99_v16  ;;  %v101_v22 = vld [vmem:[#allocation2 + $0x40] sm:$0xff]  ;;  %v116_v25 = vld [vmem:[#allocation4 + $0x30] sm:$0xff] }
  0x4e   :  { %1394 = vmatpush3.bf16.msra.mxu1 %v1901_v15  ;;  %v102_v23 = vld [vmem:[#allocation2 + $0x48] sm:$0xff]  ;;  %v1913_v24 = vpack.c.bf16 %v115_v20, %v114_v19  ;;  %v117_v26 = vld [vmem:[#allocation4 + $0x38] sm:$0xff]  ;;  %v103_v28 = vld [vmem:[#allocation2 + $0x50] sm:$0xff] }
  0x4f   :  { %1395 = vmatprep.subr.bf16.mxu1 %v1749_v0  ;;  %v1917_v27 = vpack.c.bf16 %v102_v23, %v101_v22  ;;  %v104_v29 = vld [vmem:[#allocation2 + $0x58] sm:$0xff]  ;;  %v1921_v30 = vpack.c.bf16 %v117_v26, %v116_v25  ;;  %v118_v31 = vld [vmem:[#allocation4 + $0x40] sm:$0xff]  ;;  %v119_v32 = vld [vmem:[#allocation4 + $0x48] sm:$0xff] }
  0x50   :  { %1373 = vmatpush3.bf16.msra.mxu0 %v1895_v7  ;;  %v1925_v33 = vpack.c.bf16 %v104_v29, %v103_v28  ;;  %v105_v34 = vld [vmem:[#allocation2 + $0x60] sm:$0xff]  ;;  %v106_v35 = vld [vmem:[#allocation2 + $0x68] sm:$0xff]  ;;  %v1929_v36 = vpack.c.bf16 %v119_v32, %v118_v31  ;;  %v120_v37 = vld [vmem:[#allocation4 + $0x50] sm:$0xff] }
  0x51   :  { %1374 = vmatprep.subr.bf16.mxu0 %v1749_v0  ;;  %v121_v38 = vld [vmem:[#allocation4 + $0x58] sm:$0xff]  ;;  %v1933_v39 = vpack.c.bf16 %v106_v35, %v105_v34  ;;  %v107_v40 = vld [vmem:[#allocation2 + $0x70] sm:$0xff]  ;;  %v209_v44 = vld [vmem:[%s2314_s0] sm:$0xf] }
  0x52   :  { %1397 = vmatpush3.bf16.msra.mxu1 %v1905_v18  ;;  %v108_v41 = vld [vmem:[#allocation2 + $0x78] sm:$0xff]  ;;  %v1937_v42 = vpack.c.bf16 %v121_v38, %v120_v37  ;;  %v122_v45 = vld [vmem:[#allocation4 + $0x60] sm:$0xff]  ;;  %v123_v46 = vld [vmem:[#allocation4 + $0x68] sm:$0xff] }
  0x53   :  { %1398 = vmatprep.subr.bf16.mxu1 %v1749_v0  ;;  %v1941_v43 = vpack.c.bf16 %v108_v41, %v107_v40  ;;  %v1953_v47 = vpack.c.bf16 %v123_v46, %v122_v45  ;;  %v124_v48 = vld [vmem:[#allocation4 + $0x70] sm:$0xff]  ;;  %v125_v49 = vld [vmem:[#allocation4 + $0x78] sm:$0xff]  ;;  %v126_v51 = vld [vmem:[#allocation6] sm:$0xff] }
  0x54   :  { %1376 = vmatpush3.bf16.msra.mxu0 %v1899_v14  ;;  %v1957_v50 = vpack.c.bf16 %v125_v49, %v124_v48  ;;  %v127_v52 = vld [vmem:[#allocation6 + $0x8] sm:$0xff]  ;;  %v128_v53 = vld [vmem:[#allocation6 + $0x10] sm:$0xff]  ;;  %v129_v55 = vld [vmem:[#allocation6 + $0x18] sm:$0xff] }
  0x55   :  { %1377 = vmatprep.subr.bf16.mxu0 %v1749_v0  ;;  %v1960_v54 = vpack.c.bf16 %v127_v52, %v126_v51  ;;  %v1963_v56 = vpack.c.bf16 %v129_v55, %v128_v53  ;;  %v130_v57 = vld [vmem:[#allocation6 + $0x20] sm:$0xff]  ;;  %v131_v58 = vld [vmem:[#allocation6 + $0x28] sm:$0xff]  ;;  %v132_v60 = vld [vmem:[#allocation6 + $0x30] sm:$0xff] }
  0x56   :  { %1400 = vmatpush3.bf16.msra.mxu1 %v1913_v24  ;;  %v1967_v59 = vpack.c.bf16 %v131_v58, %v130_v57  ;;  %v133_v61 = vld [vmem:[#allocation6 + $0x38] sm:$0xff]  ;;  %v134_v63 = vld [vmem:[#allocation6 + $0x40] sm:$0xff]  ;;  %v135_v2 = vld [vmem:[#allocation6 + $0x48] sm:$0xff] }
  0x57   :  { %1401 = vmatprep.subr.bf16.mxu1 %v1749_v0  ;;  %v1971_v62 = vpack.c.bf16 %v133_v61, %v132_v60  ;;  %v1975_v3 = vpack.c.bf16 %v135_v2, %v134_v63  ;;  %v136_v4 = vld [vmem:[#allocation6 + $0x50] sm:$0xff]  ;;  %v137_v6 = vld [vmem:[#allocation6 + $0x58] sm:$0xff]  ;;  %v1987_v9 = vld [vmem:[%s2316_s2] ss:$0 sm:$0xff] }
  0x58   :  { %1379 = vmatpush3.bf16.msra.mxu0 %v1909_v21  ;;  %v1979_v8 = vpack.c.bf16 %v137_v6, %v136_v4  ;;  %v138_v17 = vld [vmem:[#allocation6 + $0x60] sm:$0xff]  ;;  %v139_v19 = vld [vmem:[#allocation6 + $0x68] sm:$0xff]  ;;  %v140_v22 = vld [vmem:[#allocation6 + $0x70] sm:$0xff] }
  0x59   :  { %1380 = vmatprep.subr.bf16.mxu0 %v1749_v0  ;;  %v1991_v20 = vpack.c.bf16 %v139_v19, %v138_v17  ;;  %v141_v23 = vld [vmem:[#allocation6 + $0x78] sm:$0xff]  ;;  %v144_v26 = vld [vmem:[%s2321_s7 + $0x8] sm:$0xff]  ;;  %v143_v29 = vld [vmem:[%s2321_s7] sm:$0xff] }
  0x5a   :  { %1403 = vmatpush3.bf16.msra.mxu1 %v1921_v30  ;;  %v1995_v25 = vpack.c.bf16 %v141_v23, %v140_v22  ;;  %v146_v28 = vld [vmem:[%s2321_s7 + $0x18] sm:$0xff]  ;;  %v145_v32 = vld [vmem:[%s2321_s7 + $0x10] sm:$0xff]  ;;  %v148_v34 = vld [vmem:[%s2321_s7 + $0x28] sm:$0xff] }
  0x5b   :  { %1404 = vmatprep.subr.bf16.mxu1 %v1749_v0  ;;  %v2007_v31 = vpack.c.bf16 %v146_v28, %v144_v26  ;;  %v150_v35 = vld [vmem:[%s2321_s7 + $0x38] sm:$0xff]  ;;  %v2018_v37 = vpack.c.bf16 %v145_v32, %v143_v29  ;;  %v147_v40 = vld [vmem:[%s2321_s7 + $0x20] sm:$0xff]  ;;  %v149_v41 = vld [vmem:[%s2321_s7 + $0x30] sm:$0xff] }
  0x5c   :  { %1382 = vmatpush3.bf16.msra.mxu0 %v1917_v27  ;;  %v2020_v38 = vpack.c.bf16 %v150_v35, %v148_v34  ;;  %v154_v45 = vld [vmem:[%s2321_s7 + $0x58] sm:$0xff]  ;;  %v2036_v46 = vpack.c.bf16 %v149_v41, %v147_v40  ;;  %v151_v49 = vld [vmem:[%s2321_s7 + $0x40] sm:$0xff]  ;;  %v153_v51 = vld [vmem:[%s2321_s7 + $0x50] sm:$0xff] }
  0x5d   :  { %1383 = vmatprep.subr.bf16.mxu0 %v1749_v0  ;;  %v156_v52 = vld [vmem:[%s2321_s7 + $0x68] sm:$0xff]  ;;  %v158_v53 = vld [vmem:[%s2321_s7 + $0x78] sm:$0xff]  ;;  %v2054_v55 = vpack.c.bf16 %v153_v51, %v151_v49  ;;  %v155_v58 = vld [vmem:[%s2321_s7 + $0x60] sm:$0xff] }
  0x5e   :  { %1406 = vmatpush3.bf16.msra.mxu1 %v1929_v36  ;;  %v2057_v57 = vpack.c.bf16 %v158_v53, %v156_v52  ;;  %v157_v60 = vld [vmem:[%s2321_s7 + $0x70] sm:$0xff]  ;;  %v160_v61 = vld [vmem:[%s2321_s7 + $0x88] sm:$0xff]  ;;  %v162_v63 = vld [vmem:[%s2321_s7 + $0x98] sm:$0xff] }
  0x5f   :  { %1407 = vmatprep.subr.bf16.mxu1 %v1749_v0  ;;  %v2072_v2 = vpack.c.bf16 %v157_v60, %v155_v58  ;;  %v2075_v4 = vpack.c.bf16 %v162_v63, %v160_v61  ;;  %v159_v6 = vld [vmem:[%s2321_s7 + $0x80] sm:$0xff]  ;;  %v165_v19 = vld [vmem:[%s2321_s7 + $0xb0] sm:$0xff]  ;;  %v168_v22 = vld [vmem:[%s2321_s7 + $0xc8] sm:$0xff] }
  0x60   :  { %1385 = vmatpush3.bf16.msra.mxu0 %v1925_v33  ;;  %v163_v17 = vld [vmem:[%s2321_s7 + $0xa0] sm:$0xff]  ;;  %v170_v23 = vld [vmem:[%s2321_s7 + $0xd8] sm:$0xff]  ;;  %v169_v32 = vld [vmem:[%s2321_s7 + $0xd0] sm:$0xff] }
  0x61   :  { %1386 = vmatprep.subr.bf16.mxu0 %v1749_v0  ;;  %v2108_v26 = vpack.c.bf16 %v165_v19, %v163_v17  ;;  %v2111_v28 = vpack.c.bf16 %v170_v23, %v168_v22  ;;  %v167_v29 = vld [vmem:[%s2321_s7 + $0xc0] sm:$0xff]  ;;  %v172_v51 = vld [vmem:[%s2321_s7 + $0xe8] sm:$0xff]  ;;  %v174_v52 = vld [vmem:[%s2321_s7 + $0xf8] sm:$0xff] }
  0x62   :  { %1409 = vmatpush3.bf16.msra.mxu1 %v1937_v42  ;;  %v2120_v34 = vpack.c.bf16 %v169_v32, %v167_v29  ;;  %v982_v35 = vld [vmem:[%s2318_s4] ss:$0 sm:$0xff]  ;;  %v2133_v53 = vpack.c.bf16 %v174_v52, %v172_v51  ;;  %v173_v60 = vld [vmem:[%s2321_s7 + $0xf0] sm:$0xff]  ;;  %v195_v19 = vld [vmem:[#allocation7 + $0x98] sm:$0xff] }
  0x63   :  { %1410 = vmatprep.subr.bf16.mxu1 %v1749_v0  ;;  %v171_v58 = vld [vmem:[%s2321_s7 + $0xe0] sm:$0xff]  ;;  %v194_v17 = vld [vmem:[#allocation7 + $0x90] sm:$0xff]  ;;  %v179_v32 = vld [vmem:[#allocation7 + $0x18] sm:$0xff] }
  0x64   :  { %1388 = vmatpush3.bf16.msra.mxu0 %v1933_v39  ;;  %v2141_v61 = vpack.c.bf16 %v173_v60, %v171_v58  ;;  %v192_v63 = vld [vmem:[#allocation7 + $0x80] sm:$0xff]  ;;  %v2150_v23 = vpack.c.bf16 %v195_v19, %v194_v17  ;;  %v178_v29 = vld [vmem:[#allocation7 + $0x10] sm:$0xff]  ;;  %v199_v52 = vld [vmem:[#allocation7 + $0xb8] sm:$0xff] }
  0x65   :  { %1389 = vmatprep.subr.bf16.mxu0 %v1749_v0  ;;  %v198_v51 = vld [vmem:[#allocation7 + $0xb0] sm:$0xff] }
  0x66   :  { %1412 = vmatpush3.bf16.msra.mxu1 %v1953_v47  ;;  %v2163_v60 = vpack.c.bf16 %v199_v52, %v198_v51  ;;  %v186_v51 = vld [vmem:[#allocation7 + $0x50] sm:$0xff]  ;;  %v187_v52 = vld [vmem:[#allocation7 + $0x58] sm:$0xff] }
  0x67   :  { %1413 = vmatprep.subr.bf16.mxu1 %v1749_v0 }
  0x68   :  { %1391 = vmatpush3.bf16.msra.mxu0 %v1941_v43 }
  0x69   :  { %1416 = vmatprep.subr.bf16.mxu0 %v1749_v0 }
  0x6a   :  { %1415 = vmatpush3.bf16.msra.mxu1 %v1957_v50 }
  0x6b   :  { %1191 = vmatmul.mubr.f32.vlgmr.msra.gmra.mrb[0].mxu0 %v209_v44  ;;  %v152_v44 = vld [vmem:[%s2321_s7 + $0x48] sm:$0xff]  ;;  %1441 = vmatprep.subr.bf16.mxu1 %v2007_v31 }
  0x6c   :  { %1260 = vmatprep.mubr.msk.f32.mxu0 %vm1750_vm0, %v1751_v1  ;;  %1418 = vmatpush3.bf16.msra.mxu0 %v1960_v54  ;;  %v2039_v48 = vpack.c.bf16 %v154_v45, %v152_v44 }
  0x6d   :  { %1419 = vmatprep.subr.bf16.mxu0 %v1749_v0 }
  0x70   :  { %1421 = vmatpush3.bf16.msra.mxu0 %v1963_v56 }
  0x71   :  { %1422 = vmatprep.subr.bf16.mxu0 %v1749_v0 }
  0x74   :  { %1424 = vmatpush3.bf16.msra.mxu0 %v1967_v59 }
  0x75   :  { %1425 = vmatprep.subr.bf16.mxu0 %v1749_v0 }
  0x78   :  { %1427 = vmatpush3.bf16.msra.mxu0 %v1971_v62 }
  0x79   :  { %1428 = vmatprep.subr.bf16.mxu0 %v1749_v0 }
  0x7c   :  { %1430 = vmatpush3.bf16.msra.mxu0 %v1975_v3 }
  0x7d   :  { %1431 = vmatprep.subr.bf16.mxu0 %v1749_v0 }
  0x80   :  { %1433 = vmatpush3.bf16.msra.mxu0 %v1979_v8 }
  0x81   :  { %1434 = vmatprep.subr.bf16.mxu0 %v1749_v0 }
  0x84   :  { %1436 = vmatpush3.bf16.msra.mxu0 %v1991_v20 }
  0x85   :  { %1437 = vmatprep.subr.bf16.mxu0 %v1749_v0 }
  0x88   :  { %1439 = vmatpush3.bf16.msra.mxu0 %v1995_v25 }
 0x13e   :  { %v282_v10 = vpop.f32.mrb[0].mxu0 }
 0x13f   :  { %v283_v11 = vadd.f32 %v1987_v9, %v282_v10  ;;  %v1192_v12 = vpop.f32.mrb[1].mxu0  ;;  %v161_v10 = vld [vmem:[%s2321_s7 + $0x90] sm:$0xff] }
 0x140   :  { %v166_v12 = vld [vmem:[%s2321_s7 + $0xb8] sm:$0xff] }
 0x141   :  { %v286_v13 = vmul.f32 0.1, %v283_v11 }
 0x143   :  { %v287_v16 = vmax.f32 %v283_v11, %v286_v13  ;;  %v164_v11 = vld [vmem:[%s2321_s7 + $0xa8] sm:$0xff]  ;;  %v2090_v13 = vpack.c.bf16 %v161_v10, %v159_v6  ;;  %v176_v10 = vld [vmem:[#allocation7] sm:$0xff] }
 0x144   :  { %v193_v6 = vld [vmem:[#allocation7 + $0x88] sm:$0xff] }
 0x145   :  { %1226 = vmatmul.mubr.f32.vlgmr.msra.gmra.mrb[0].mxu1 %v287_v16  ;;  %v2093_v16 = vpack.c.bf16 %v166_v12, %v164_v11  ;;  %v2146_v11 = vpack.c.bf16 %v193_v6, %v192_v63  ;;  %v177_v12 = vld [vmem:[#allocation7 + $0x8] sm:$0xff]  ;;  %v182_v63 = vld [vmem:[#allocation7 + $0x30] sm:$0xff]  ;;  %v183_v6 = vld [vmem:[#allocation7 + $0x38] sm:$0xff] }
 0x146   :  { %518 = vmatprep.mubr.f32.mxu1 %v1751_v1  ;;  %1443 = vmatpush1.bf16.msra.mxu1 %v2018_v37  ;;  %v2148_v22 = vpack.c.bf16 %v177_v12, %v176_v10  ;;  %v200_v10 = vld [vmem:[#allocation7 + $0xc0] sm:$0xff]  ;;  %v201_v12 = vld [vmem:[#allocation7 + $0xc8] sm:$0xff]  ;;  %v2166_v17 = vpack.c.bf16 %v183_v6, %v182_v63  ;;  %v2178_v63 = vpack.c.bf16 %v187_v52, %v186_v51 }
 0x147   :  { %1445 = vmatprep.subr.bf16.mxu1 %v2020_v38  ;;  %1473 = vmatprep.subr.bf16.mxu0 %v2146_v11  ;;  %v2169_v19 = vpack.c.bf16 %v201_v12, %v200_v10  ;;  %v2185_v6 = vld [vmem:[%s2320_s6] ss:$0 sm:$0xff] }
 0x14a   :  { %1447 = vmatpush1.bf16.msra.mxu1 %v2036_v46 }
 0x14b   :  { %1449 = vmatprep.subr.bf16.mxu1 %v2039_v48 }
 0x14e   :  { %1451 = vmatpush1.bf16.msra.mxu1 %v2054_v55 }
 0x14f   :  { %1453 = vmatprep.subr.bf16.mxu1 %v2057_v57 }
 0x152   :  { %1455 = vmatpush1.bf16.msra.mxu1 %v2072_v2 }
 0x153   :  { %1457 = vmatprep.subr.bf16.mxu1 %v2075_v4 }
 0x156   :  { %1459 = vmatpush1.bf16.msra.mxu1 %v2090_v13 }
 0x157   :  { %1461 = vmatprep.subr.bf16.mxu1 %v2093_v16 }
 0x15a   :  { %1463 = vmatpush1.bf16.msra.mxu1 %v2108_v26 }
 0x15b   :  { %1465 = vmatprep.subr.bf16.mxu1 %v2111_v28 }
 0x15e   :  { %1467 = vmatpush1.bf16.msra.mxu1 %v2120_v34 }
 0x15f   :  { %1469 = vmatprep.subr.bf16.mxu1 %v2133_v53 }
 0x162   :  { %1471 = vmatpush1.bf16.msra.mxu1 %v2141_v61 }
 0x163   :  { %1504 = vmatprep.subr.bf16.mxu1 %v1749_v0 }
 0x218   :  { %v359_v40 = vpop.f32.mrb[0].mxu1 }
 0x219   :  { %v360_v41 = vadd.f32 %v982_v35, %v359_v40  ;;  %v1227_v44 = vpop.f32.mrb[1].mxu1  ;;  %v196_v35 = vld [vmem:[#allocation7 + $0xa0] sm:$0xff]  ;;  %v197_v40 = vld [vmem:[#allocation7 + $0xa8] sm:$0xff] }
 0x21a   :  { %v2157_v44 = vpack.c.bf16 %v197_v40, %v196_v35  ;;  %v202_v35 = vld [vmem:[#allocation7 + $0xd0] sm:$0xff]  ;;  %v203_v40 = vld [vmem:[#allocation7 + $0xd8] sm:$0xff] }
 0x21b   :  { %v363_v45 = vmul.f32 0.1, %v360_v41 }
 0x21d   :  { %v364_v49 = vmax.f32 %v360_v41, %v363_v45  ;;  %v2154_v41 = vpack.c.bf16 %v179_v32, %v178_v29  ;;  %v180_v45 = vld [vmem:[#allocation7 + $0x20] sm:$0xff]  ;;  %v185_v32 = vld [vmem:[#allocation7 + $0x48] sm:$0xff] }
 0x21e   :  { %v184_v29 = vld [vmem:[#allocation7 + $0x40] sm:$0xff] }
 0x21f   :  { %1261 = vmatmul.mubr.f32.vlgmr.msra.gmra.mrb[2].mxu0 %v364_v49  ;;  %v181_v49 = vld [vmem:[#allocation7 + $0x28] sm:$0xff] }
 0x220   :  { %1475 = vmatpush3.bf16.msra.mxu0 %v2148_v22  ;;  %v2160_v58 = vpack.c.bf16 %v181_v49, %v180_v45  ;;  %v2172_v45 = vpack.c.bf16 %v185_v32, %v184_v29  ;;  %v2175_v49 = vpack.c.bf16 %v203_v40, %v202_v35 }
 0x221   :  { %1477 = vmatprep.subr.bf16.mxu0 %v2150_v23 }
 0x224   :  { %1479 = vmatpush3.bf16.msra.mxu0 %v2154_v41 }
 0x225   :  { %1481 = vmatprep.subr.bf16.mxu0 %v2157_v44 }
 0x228   :  { %1483 = vmatpush3.bf16.msra.mxu0 %v2160_v58 }
 0x229   :  { %1485 = vmatprep.subr.bf16.mxu0 %v2163_v60 }
 0x22c   :  { %1487 = vmatpush3.bf16.msra.mxu0 %v2166_v17 }
 0x22d   :  { %1489 = vmatprep.subr.bf16.mxu0 %v2169_v19 }
 0x230   :  { %1491 = vmatpush3.bf16.msra.mxu0 %v2172_v45 }
 0x231   :  { %1493 = vmatprep.subr.bf16.mxu0 %v2175_v49 }
 0x234   :  { %1495 = vmatpush3.bf16.msra.mxu0 %v2178_v63 }
 0x2f2   :  { %v437_v10 = vpop.f32.mrb[2].mxu0 }
 0x2f3   :  { %v438_v12 = vadd.f32 %v2185_v6, %v437_v10  ;;  %v1262_v29 = vpop.f32.mrb[3].mxu0 }
 0x2f5   :  { %v441_v32 = vmul.f32 0.1, %v438_v12 }
 0x2f7   :  { %v442_v35 = vmax.f32 %v438_v12, %v441_v32 }
 0x2f9   :  { %519 = vmatmul.mubr.f32.vlgmr.msra.gmra.mrb[2].mxu1 %v442_v35 }
 0x2fa   :  { %1506 = vmatpush3.bf16.msra.mxu1 %v1892_v5  ;;  %1295 = vmatprep.mubr.msk.f32.mxu1 %vm1750_vm0, %v1751_v1  ;;  %v606_v5 = vld [vmem:[%s2314_s0 + $0x4] sm:$0xf] }
 0x2fb   :  { %1507 = vmatprep.subr.bf16.mxu1 %v1749_v0 }
 0x2fe   :  { %1509 = vmatpush3.bf16.msra.mxu1 %v1895_v7  ;;  %v204_v7 = vld [vmem:[#allocation7 + $0xe0] sm:$0xff] }
 0x2ff   :  { %1510 = vmatprep.subr.bf16.mxu1 %v1749_v0 }
 0x302   :  { %1512 = vmatpush3.bf16.msra.mxu1 %v1899_v14  ;;  %v205_v14 = vld [vmem:[#allocation7 + $0xe8] sm:$0xff] }
 0x303   :  { %1513 = vmatprep.subr.bf16.mxu1 %v1749_v0 }
 0x306   :  { %1515 = vmatpush3.bf16.msra.mxu1 %v1909_v21  ;;  %v2227_v21 = vpack.c.bf16 %v205_v14, %v204_v7 }
 0x307   :  { %1516 = vmatprep.subr.bf16.mxu1 %v1749_v0 }
 0x308   :  { %1497 = vmatprep.subr.bf16.mxu0 %v2227_v21 }
 0x30a   :  { %1518 = vmatpush3.bf16.msra.mxu1 %v1917_v27  ;;  %v188_v27 = vld [vmem:[#allocation7 + $0x60] sm:$0xff] }
 0x30b   :  { %1519 = vmatprep.subr.bf16.mxu1 %v1749_v0 }
 0x30e   :  { %1521 = vmatpush3.bf16.msra.mxu1 %v1925_v33  ;;  %v189_v33 = vld [vmem:[#allocation7 + $0x68] sm:$0xff] }
 0x30f   :  { %1522 = vmatprep.subr.bf16.mxu1 %v1749_v0 }
 0x312   :  { %1524 = vmatpush3.bf16.msra.mxu1 %v1933_v39  ;;  %v2229_v39 = vpack.c.bf16 %v189_v33, %v188_v27 }
 0x313   :  { %1525 = vmatprep.subr.bf16.mxu1 %v1749_v0 }
 0x314   :  { %1499 = vmatpush3.bf16.msra.mxu0 %v2229_v39 }
 0x316   :  { %1527 = vmatpush3.bf16.msra.mxu1 %v1941_v43  ;;  %v206_v43 = vld [vmem:[#allocation7 + $0xf0] sm:$0xff] }
 0x317   :  { %1552 = vmatprep.subr.bf16.mxu1 %v1749_v0 }
 0x319   :  { %1296 = vmatmul.mubr.f32.vlgmr.msra.gmra.mrb[4].mxu1 %v606_v5 }
 0x31a   :  { %1554 = vmatpush3.bf16.msra.mxu1 %v1960_v54  ;;  %1365 = vmatprep.mubr.msk.f32.mxu1 %vm1750_vm0, %v1751_v1  ;;  %v207_v54 = vld [vmem:[#allocation7 + $0xf8] sm:$0xff] }
 0x31b   :  { %1555 = vmatprep.subr.bf16.mxu1 %v1749_v0 }
 0x31e   :  { %1557 = vmatpush3.bf16.msra.mxu1 %v1963_v56  ;;  %v2233_v56 = vpack.c.bf16 %v207_v54, %v206_v43 }
 0x31f   :  { %1558 = vmatprep.subr.bf16.mxu1 %v1749_v0 }
 0x320   :  { %1501 = vmatprep.subr.bf16.mxu0 %v2233_v56 }
 0x322   :  { %1560 = vmatpush3.bf16.msra.mxu1 %v1967_v59  ;;  %v190_v59 = vld [vmem:[#allocation7 + $0x70] sm:$0xff] }
 0x323   :  { %1561 = vmatprep.subr.bf16.mxu1 %v1749_v0 }
 0x326   :  { %1563 = vmatpush3.bf16.msra.mxu1 %v1971_v62  ;;  %v191_v62 = vld [vmem:[#allocation7 + $0x78] sm:$0xff] }
 0x327   :  { %1564 = vmatprep.subr.bf16.mxu1 %v1749_v0 }
 0x32a   :  { %1566 = vmatpush3.bf16.msra.mxu1 %v1975_v3  ;;  %v2235_v3 = vpack.c.bf16 %v191_v62, %v190_v59 }
 0x32b   :  { %1567 = vmatprep.subr.bf16.mxu1 %v1749_v0 }
 0x32c   :  { %1503 = vmatpush3.bf16.msra.mxu0 %v2235_v3 }
 0x32d   :  { %1528 = vmatprep.subr.bf16.mxu0 %v1749_v0 }
 0x32e   :  { %1569 = vmatpush3.bf16.msra.mxu1 %v1979_v8  ;;  %v444_v8 = vlaneseq }
 0x32f   :  { %1570 = vmatprep.subr.bf16.mxu1 %v1749_v0 }
 0x332   :  { %1572 = vmatpush3.bf16.msra.mxu1 %v1991_v20  ;;  %v445_v20 = vshrl.u32 %v444_v8, 7 }
 0x333   :  { %1573 = vmatprep.subr.bf16.mxu1 %v1749_v0 }
 0x334   :  { %v450_v40 = vsub.s32 1, %v445_v20 }
 0x336   :  { %1575 = vmatpush3.bf16.msra.mxu1 %v1995_v25  ;;  %v446_v25 = vsub.s32 0, %v445_v20 }
 0x337   :  { %1609 = vmatprep.subr.bf16.mxu1 %v2146_v11  ;;  %v175_v11 = vld [vmem:[%s2322_s8] sm:$0x3] }
 0x338   :  { %v2243_v51 = vrot.slane %v175_v11, %v446_v25  ;;  %v2245_v52 = vrot.slane %v175_v11, %v450_v40 }
 0x3cc   :  { %v520_v10 = vpop.f32.mrb[2].mxu1 }
 0x3cd   :  { %v521_v12 = vadd.f32 %v520_v10, %v2243_v51  ;;  %v522_v29 = vpop.f32.mrb[3].mxu1 }
 0x3ce   :  { %v523_v32 = vadd.f32 %v522_v29, %v2245_v52 }
 0x3cf   :  { %v525_v35 = vmul.f32 0.1, %v521_v12 }
 0x3d0   :  { %v526_v5 = vmul.f32 0.1, %v523_v32 }
 0x3d1   :  { %v527_v14 = vmax.f32 %v521_v12, %v525_v35 }
 0x3d2   :  { %v528_v7 = vmax.f32 %v523_v32, %v526_v5 }
 0x3d4   :  { %599 = vmatprep.mubr.f32.mxu0 %v528_v7 }
 0x3d5   :  { %600 = vmatmul.mubr.f32.vlgmr.msra.gmra.mrb[4].mxu0 %v527_v14 }
 0x3d6   :  { %1530 = vmatpush3.bf16.msra.mxu0 %v1901_v15  ;;  %1330 = vmatprep.mubr.msk.f32.mxu0 %vm1750_vm0, %v1751_v1 }
 0x3d7   :  { %1531 = vmatprep.subr.bf16.mxu0 %v1749_v0 }
 0x3da   :  { %1533 = vmatpush3.bf16.msra.mxu0 %v1905_v18 }
 0x3db   :  { %1534 = vmatprep.subr.bf16.mxu0 %v1749_v0 }
 0x3de   :  { %1536 = vmatpush3.bf16.msra.mxu0 %v1913_v24 }
 0x3df   :  { %1537 = vmatprep.subr.bf16.mxu0 %v1749_v0 }
 0x3e2   :  { %1539 = vmatpush3.bf16.msra.mxu0 %v1921_v30 }
 0x3e3   :  { %1540 = vmatprep.subr.bf16.mxu0 %v1749_v0 }
 0x3e6   :  { %1542 = vmatpush3.bf16.msra.mxu0 %v1929_v36 }
 0x3e7   :  { %1543 = vmatprep.subr.bf16.mxu0 %v1749_v0 }
 0x3ea   :  { %1545 = vmatpush3.bf16.msra.mxu0 %v1937_v42 }
 0x3eb   :  { %1546 = vmatprep.subr.bf16.mxu0 %v1749_v0 }
 0x3ec   :  { %v673_v15 = vpop.f32.mrb[4].mxu1 }
 0x3ed   :  { %v674_v18 = vadd.f32 %v1987_v9, %v673_v15  ;;  %v1297_v27 = vpop.f32.mrb[5].mxu1 }
 0x3ee   :  { %1548 = vmatpush3.bf16.msra.mxu0 %v1953_v47 }
 0x3ef   :  { %v677_v24 = vmul.f32 0.1, %v674_v18  ;;  %1549 = vmatprep.subr.bf16.mxu0 %v1749_v0 }
 0x3f1   :  { %v678_v30 = vmax.f32 %v674_v18, %v677_v24 }
 0x3f2   :  { %1551 = vmatpush3.bf16.msra.mxu0 %v1957_v50  ;;  %v985_v50 = vld [vmem:[%s2318_s4 + $0x1] ss:$0 sm:$0xff] }
 0x3f3   :  { %1577 = vmatprep.subr.bf16.mxu0 %v2007_v31 }
 0x3f5   :  { %1331 = vmatmul.mubr.f32.vlgmr.msra.gmra.mrb[6].mxu0 %v678_v30 }
 0x3f6   :  { %1579 = vmatpush1.bf16.msra.mxu0 %v2018_v37  ;;  %892 = vmatprep.mubr.f32.mxu0 %v1751_v1  ;;  %v984_v1 = vld [vmem:[%s2324_s10] ss:$0 sm:$0xff] }
 0x3f7   :  { %1581 = vmatprep.subr.bf16.mxu0 %v2020_v38 }
 0x3fa   :  { %1583 = vmatpush1.bf16.msra.mxu0 %v2036_v46 }
 0x3fb   :  { %1585 = vmatprep.subr.bf16.mxu0 %v2039_v48 }
 0x3fe   :  { %1587 = vmatpush1.bf16.msra.mxu0 %v2054_v55 }
 0x3ff   :  { %1589 = vmatprep.subr.bf16.mxu0 %v2057_v57 }
 0x402   :  { %1591 = vmatpush1.bf16.msra.mxu0 %v2072_v2 }
 0x403   :  { %1593 = vmatprep.subr.bf16.mxu0 %v2075_v4 }
 0x406   :  { %1595 = vmatpush1.bf16.msra.mxu0 %v2090_v13 }
 0x407   :  { %1597 = vmatprep.subr.bf16.mxu0 %v2093_v16 }
 0x40a   :  { %1599 = vmatpush1.bf16.msra.mxu0 %v2108_v26 }
 0x40b   :  { %1601 = vmatprep.subr.bf16.mxu0 %v2111_v28 }
 0x40e   :  { %1603 = vmatpush1.bf16.msra.mxu0 %v2120_v34 }
 0x40f   :  { %1605 = vmatprep.subr.bf16.mxu0 %v2133_v53 }
 0x412   :  { %1607 = vmatpush1.bf16.msra.mxu0 %v2141_v61 }
 0x4a8   :  { %v1069_v0 = vpop.f32.mrb[4].mxu0 }
 0x4a9   :  { %v1070_v36 = vpop.f32.mrb[5].mxu0 }
 0x4aa   :  { %v1071_v42 = vadd.f32 %v1070_v36, %v1069_v0 }
 0x4ac   :  { %v602_v47 = vadd.f32 %v1071_v42, %v984_v1 }
 0x4ae   :  { %605 = vst [vmem:[%s2325_s11] sm:$0xf] %v602_v47 }
 0x4c8   :  { %v750_v9 = vpop.f32.mrb[6].mxu0 }
 0x4c9   :  { %v751_v31 = vadd.f32 %v985_v50, %v750_v9  ;;  %v1332_v37 = vpop.f32.mrb[7].mxu0 }
 0x4cb   :  { %v754_v38 = vmul.f32 0.1, %v751_v31 }
 0x4cd   :  { %v755_v46 = vmax.f32 %v751_v31, %v754_v38 }
 0x4cf   :  { %1366 = vmatmul.mubr.f32.vlgmr.msra.gmra.mrb[6].mxu1 %v755_v46 }
 0x4d0   :  { %1611 = vmatpush3.bf16.msra.mxu1 %v2148_v22 }
 0x4d1   :  { %1613 = vmatprep.subr.bf16.mxu1 %v2150_v23 }
 0x4d4   :  { %1615 = vmatpush3.bf16.msra.mxu1 %v2154_v41 }
 0x4d5   :  { %1617 = vmatprep.subr.bf16.mxu1 %v2157_v44 }
 0x4d8   :  { %1619 = vmatpush3.bf16.msra.mxu1 %v2160_v58 }
 0x4d9   :  { %1621 = vmatprep.subr.bf16.mxu1 %v2163_v60 }
 0x4dc   :  { %1623 = vmatpush3.bf16.msra.mxu1 %v2166_v17 }
 0x4dd   :  { %1625 = vmatprep.subr.bf16.mxu1 %v2169_v19 }
 0x4e0   :  { %1627 = vmatpush3.bf16.msra.mxu1 %v2172_v45 }
 0x4e1   :  { %1629 = vmatprep.subr.bf16.mxu1 %v2175_v49 }
 0x4e4   :  { %1631 = vmatpush3.bf16.msra.mxu1 %v2178_v63 }
 0x4e5   :  { %1633 = vmatprep.subr.bf16.mxu1 %v2227_v21 }
 0x4e8   :  { %1635 = vmatpush3.bf16.msra.mxu1 %v2229_v39 }
 0x4e9   :  { %1637 = vmatprep.subr.bf16.mxu1 %v2233_v56 }
 0x4ec   :  { %1639 = vmatpush3.bf16.msra.mxu1 %v2235_v3 }
 0x5a2   :  { %v822_v48 = vpop.f32.mrb[6].mxu1 }
 0x5a3   :  { %v823_v55 = vadd.f32 %v2185_v6, %v822_v48  ;;  %v1367_v57 = vpop.f32.mrb[7].mxu1 }
 0x5a5   :  { %v826_v2 = vmul.f32 0.1, %v823_v55 }
 0x5a7   :  { %v827_v4 = vmax.f32 %v823_v55, %v826_v2 }
 0x5a9   :  { %893 = vmatmul.mubr.f32.vlgmr.msra.gmra.mrb[8].mxu0 %v827_v4 }
 0x67c   :  { %v894_v13 = vpop.f32.mrb[8].mxu0 }
 0x67d   :  { %v895_v16 = vadd.f32 %v894_v13, %v2243_v51  ;;  %v896_v26 = vpop.f32.mrb[9].mxu0 }
 0x67e   :  { %v897_v28 = vadd.f32 %v896_v26, %v2245_v52 }
 0x67f   :  { %v899_v34 = vmul.f32 0.1, %v895_v16 }
 0x680   :  { %v900_v53 = vmul.f32 0.1, %v897_v28 }
 0x681   :  { %v901_v22 = vmax.f32 %v895_v16, %v899_v34 }
 0x682   :  { %v902_v61 = vmax.f32 %v897_v28, %v900_v53 }
 0x684   :  { %967 = vmatprep.mubr.f32.mxu1 %v902_v61 }
 0x685   :  { %968 = vmatmul.mubr.f32.vlgmr.msra.gmra.mrb[8].mxu1 %v901_v22 }
 0x758   :  { %v1155_v23 = vpop.f32.mrb[8].mxu1 }
 0x759   :  { %v1156_v41 = vpop.f32.mrb[9].mxu1 }
 0x75a   :  { %v1157_v44 = vadd.f32 %v1156_v41, %v1155_v23 }
 0x75c   :  { %v970_v58 = vadd.f32 %v1157_v44, %v984_v1 }
 0x75e   :  { %973 = vst [vmem:[%s2325_s11 + $0x4] sm:$0xf] %v970_v58 }
 0x75f   :  { %978 = vsyncpa [#allocation3], 1 }
 0x760   :  { %979 = vsyncpa [#allocation5], 1 }
 0x761   :  { %980 = vsyncpa [#allocation8], 1 }

</bundles_post_ra>
